<compile_context>
chip_gen: v5e
topology: v5e:2x2
jax: 0.10.0
libtpu: 0.0.40
codegen_flags: <defaults>
</compile_context>

<pallas_src>
import jax
import jax.numpy as jnp
from jax.experimental import pallas as pl
from jax.experimental.pallas import tpu as pltpu


def _swish_kernel(x_ref, o_ref):
    x = x_ref[...]
    xf = x.astype(jnp.float32)  # no-op for f32; precision upcast for bf16
    o_ref[...] = (xf * jax.nn.sigmoid(xf)).astype(o_ref.dtype)


def _choose_cols(n: int, max_cols: int) -> int:
    """Widest power-of-two column count in [128, max_cols] that divides
    n rounded up to a multiple of 128 (so padding is at most 127 elements)."""
    n128 = ((n + 127) // 128) * 128
    cols = max_cols
    while cols > 128 and n128 % cols != 0:
        cols //= 2
    return cols


def swish(x, *, tile_rows=256, max_cols=2048, min_pallas_bytes=1 << 20):
    """Elementwise swish / SiLU: x * sigmoid(x). Accepts any shape / float dtype."""
    x = jnp.asarray(x)
    orig_shape = x.shape
    dtype = x.dtype
    n = x.size

    # Tiny tensors: pallas_call launch + pipeline setup dominates; plain XLA wins.
    if n == 0 or n * dtype.itemsize < min_pallas_bytes:
        xf = x.astype(jnp.float32)
        return (xf * jax.nn.sigmoid(xf)).astype(dtype)

    cols = _choose_cols(n, max_cols)
    pad = (-n) % cols  # 0 whenever n is already a multiple of 128
    x_flat = x.reshape(-1)
    if pad:
        x_flat = jnp.pad(x_flat, (0, pad))  # swish(0) == 0, padding is harmless

    rows = (n + pad) // cols
    block_rows = min(tile_rows, rows)       # full-extent block when rows < tile_rows
    grid = (pl.cdiv(rows, block_rows),)     # partial last block handled by Pallas

    x2d = x_flat.reshape(rows, cols)
    out2d = pl.pallas_call(
        _swish_kernel,
        out_shape=jax.ShapeDtypeStruct((rows, cols), dtype),
        grid_spec=pltpu.PrefetchScalarGridSpec(
            num_scalar_prefetch=0,
            grid=grid,
            in_specs=[pl.BlockSpec((block_rows, cols), lambda i: (i, 0))],
            out_specs=pl.BlockSpec((block_rows, cols), lambda i: (i, 0)),
        ),
        compiler_params=pltpu.CompilerParams(
            dimension_semantics=("parallel",),     # lets v7x shard steps over 2 TCs
            vmem_limit_bytes=32 * 1024 * 1024,     # safe on v5e/v6e/v7x
        ),
    )(x2d)

    out_flat = out2d.reshape(-1)
    if pad:
        out_flat = out_flat[:n]
    return out_flat.reshape(orig_shape)


if __name__ == "__main__":
    key = jax.random.PRNGKey(0)
    k1, k2, k3 = jax.random.split(key, 3)

    def ref(x):
        xf = x.astype(jnp.float32)
        return (xf * jax.nn.sigmoid(xf)).astype(x.dtype)

    # 1) Spec-sized input (2, 4, 16, 16), forced through the Pallas path.
    x_small = jax.random.normal(k1, (2, 4, 16, 16), dtype=jnp.float32)
    y_small = swish(x_small, min_pallas_bytes=0)
    jax.block_until_ready(y_small)
    assert y_small.shape == x_small.shape and y_small.dtype == x_small.dtype
    assert jnp.allclose(y_small, ref(x_small), atol=1e-6, rtol=1e-6)

    # 2) Larger f32 input exercising the wide, multi-step tiled grid (grid=4).
    x_big = jax.random.normal(k2, (8, 64, 64, 64), dtype=jnp.float32)
    y_big = swish(x_big)
    jax.block_until_ready(y_big)
    assert jnp.allclose(y_big, ref(x_big), atol=1e-6, rtol=1e-6)

    # 3) bf16 + ragged size (not a multiple of 128) -> minimal pad/slice path.
    x_bf = jax.random.normal(k3, (3, 5, 7), dtype=jnp.bfloat16)
    y_bf = swish(x_bf, min_pallas_bytes=0)
    jax.block_until_ready(y_bf)
    assert y_bf.shape == x_bf.shape and y_bf.dtype == jnp.bfloat16
    assert jnp.allclose(y_bf.astype(jnp.float32), ref(x_bf).astype(jnp.float32),
                        atol=1e-2, rtol=1e-2)

    print("KERNEL_OK")
</pallas_src>

<mosaic_0001>
module attributes {stable_mosaic.version = 11 : i64} {
  func.func @_swish_kernel(%arg0: i32, %arg1: memref<1x2048xf32, #tpu.memory_space<vmem>>, %arg2: memref<1x2048xf32, #tpu.memory_space<vmem>>) attributes {dimension_semantics = [#tpu.dimension_semantics<parallel>], iteration_bounds = array<i64: 1>, scalar_prefetch = 0 : i64, scratch_operands = 0 : i64, tpu.core_type = #tpu.core_type<tc>, window_params = [{transform_indices = @transform_0, window_bounds = array<i64: 1, 2048>}, {transform_indices = @transform_1, window_bounds = array<i64: 1, 2048>}]} {
    %c0 = arith.constant 0 : index
    %c0_0 = arith.constant 0 : index
    %0 = vector.load %arg1[%c0, %c0_0] : memref<1x2048xf32, #tpu.memory_space<vmem>>, vector<1x2048xf32>
    %1 = arith.negf %0 : vector<1x2048xf32>
    %2 = math.exp %1 : vector<1x2048xf32>
    %cst = arith.constant 1.000000e+00 : f32
    %3 = vector.broadcast %cst : f32 to vector<1x2048xf32>
    %4 = arith.addf %3, %2 : vector<1x2048xf32>
    %5 = arith.divf %3, %4 : vector<1x2048xf32>
    %6 = arith.mulf %0, %5 : vector<1x2048xf32>
    %c0_1 = arith.constant 0 : index
    %c0_2 = arith.constant 0 : index
    %7 = vector.load %arg2[%c0_1, %c0_2] : memref<1x2048xf32, #tpu.memory_space<vmem>>, vector<1x2048xf32>
    tpu.vector_store %arg2[%c0_1, %c0_2], %6 {strides = array<i32>} : memref<1x2048xf32, #tpu.memory_space<vmem>>, vector<1x2048xf32>,
    return
  }
  func.func @transform_0(%arg0: i32) -> (i32, i32) {
    %c0_i32 = arith.constant 0 : i32
    %c0_i32_0 = arith.constant 0 : i32
    return %arg0, %c0_i32 : i32, i32
  }
  func.func @transform_1(%arg0: i32) -> (i32, i32) {
    %c0_i32 = arith.constant 0 : i32
    %c0_i32_0 = arith.constant 0 : i32
    return %arg0, %c0_i32 : i32, i32
  }
}

</mosaic_0001>

<bundles_post_ra>
// kernel: tpu_custom_call.1
= control target key start
LH: loop header
LB: loop body
LE: loop exit
PB: predicated region body
PF: predicated region fallthrough
CT: control target
= control target key end

     0   :  { %6 = vsyncpa [#allocation3], 0  ;;  %s166_s0 = inlined_call_operand.hbm [shape: f32[1,2048], index: 0, kind: input, shape index: {}]   ;;  %s167_s1 = inlined_call_operand.hbm [shape: f32[1,2048], index: 1, kind: output, shape index: {}]  }
   0x1   :  { %7 = vsyncpa [#allocation4], 0  ;;  %s13_s8 = sshll.u32 %s166_s0, 4  ;;  %s148_s9 = smov [#allocation2]   ;;  %s14_s8 = int_to_ptr.hbm [resolvable:$true] %s13_s8 }
   0x2   :  { %s15_s10 = sshll.u32 %s148_s9, 4  ;;  %s16_s10 = int_to_ptr.vmem [resolvable:$true] %s15_s10 }
   0x3   :  { %18 = dma.hbm_to_vmem [thread:$0]  %s14_s8, 256, %s16_s10, [#allocation3]  }
   0x4   :  { %144 = dma.done.wait [#allocation3], 256  }
   0x5   :  { %145 = vsyncadd [#allocation3], 4294967040  ;;  %v23_v0 = vld [vmem:[#allocation2] sm:$0xff]  ;;  %v24_v1 = vld [vmem:[#allocation2 + $0x8] sm:$0xff]  ;;  %s149_s0 = smov [#allocation5]   ;;  %s74_s14 = sshll.u32 %s167_s1, 4  ;;  %s75_s14 = int_to_ptr.hbm [resolvable:$true] %s74_s14 }
   0x6   :  { %v84_v2 = vmul.f32 -1.442695, %v23_v0  ;;  %v85_v3 = vmul.f32 -1.442695, %v24_v1  ;;  %s72_s11 = sshll.u32 %s149_s0, 4  ;;  %s73_s11 = int_to_ptr.vmem [resolvable:$true] %s72_s11 }
   0x8   :  { %88 = vpow2.f32 %v84_v2 }
   0x9   :  { %90 = vpow2.f32 %v85_v3 }
   0xe   :  { %v89_v4 = vpop.eup %88 }
   0xf   :  { %v91_v5 = vpop.eup %90  ;;  %v31_v6 = vadd.f32 1.0, %v89_v4 }
  0x10   :  { %v32_v7 = vadd.f32 1.0, %v91_v5 }
  0x11   :  { %92 = vrcp.f32 %v31_v6  ;;  %vm38_vm0 = vweird.f32 %v31_v6  ;;  %v44_v11 = vand.u32 2147483648, %v31_v6  ;;  %v42_v14 = vand.u32 2147483647, %v31_v6 }
  0x12   :  { %94 = vrcp.f32 %v32_v7  ;;  %v59_v15 = vand.u32 2147483648, %v32_v7  ;;  %vm53_vm2 = vweird.f32 %v32_v7  ;;  %v57_v17 = vand.u32 2147483647, %v32_v7 }
  0x13   :  { %v45_v19 = vor.u32 1.1754944e-38, %v44_v11  ;;  %vm43_vm5 = vcmp.eq.f32.partialorder %v42_v14, 8.507059e+37 }
  0x14   :  { %v60_v22 = vor.u32 1.1754944e-38, %v59_v15  ;;  %vm58_vm7 = vcmp.eq.f32.partialorder %v57_v17, 8.507059e+37 }
  0x17   :  { %v93_v8 = vpop.eup %92 }
  0x18   :  { %v95_v9 = vpop.eup %94  ;;  %v34_v10 = vmul.f32 %v93_v8, %v31_v6  ;;  %vm39_vm1 = vweird.f32 %v93_v8 }
  0x19   :  { %v49_v12 = vmul.f32 %v95_v9, %v32_v7  ;;  %vm54_vm3 = vweird.f32 %v95_v9  ;;  %vm40_vm4 = vmor %vm38_vm0, %vm39_vm1 }
  0x1a   :  { %v35_v13 = vsub.f32 1.0, %v34_v10  ;;  %vm55_vm6 = vmor %vm53_vm2, %vm54_vm3 }
  0x1b   :  { %v50_v16 = vsub.f32 1.0, %v49_v12 }
  0x1c   :  { %v36_v18 = vmul.f32 %v93_v8, %v35_v13 }
  0x1d   :  { %v51_v20 = vmul.f32 %v95_v9, %v50_v16 }
  0x1e   :  { %v37_v21 = vadd.f32 %v93_v8, %v36_v18 }
  0x1f   :  { %v52_v23 = vadd.f32 %v95_v9, %v51_v20 }
  0x20   :  { %v41_v24 = vsel %vm40_vm4, %v93_v8, %v37_v21 }
  0x21   :  { %v46_v25 = vsel %vm43_vm5, %v45_v19, %v41_v24  ;;  %v56_v26 = vsel %vm55_vm6, %v95_v9, %v52_v23 }
  0x22   :  { %v63_v27 = vmul.f32 %v46_v25, %v23_v0  ;;  %v61_v28 = vsel %vm58_vm7, %v60_v22, %v56_v26 }
  0x23   :  { %v64_v29 = vmul.f32 %v61_v28, %v24_v1 }
  0x24   :  { %65 = vst [vmem:[#allocation5] sm:$0xff] %v63_v27 }
  0x25   :  { %66 = vst [vmem:[#allocation5 + $0x8] sm:$0xff] %v64_v29 }
  0x26   :  { %77 = dma.vmem_to_hbm [thread:$0]  %s73_s11, 256, %s75_s14, [#allocation4]  }
  0x27   :  { %146 = dma.done.wait [#allocation4], 256  }
  0x28   :  { %147 = vsyncadd [#allocation4], 4294967040 }
  0x29   :  { %82 = vsyncpa [#allocation3], 1 }
  0x2a   :  { %83 = vsyncpa [#allocation4], 1 }

</bundles_post_ra>
